<compile_context>
chip_gen: v7x
topology: tpu7x:2x2x1
jax: 0.10.0
libtpu: 0.0.40
codegen_flags: <defaults>
</compile_context>

<pallas_src>
import jax
import jax.numpy as jnp
from jax.experimental import pallas as pl
from jax.experimental.pallas import tpu as pltpu

_OUT_BLOCK_TARGET = 8 * 1024 * 1024     # ~8 MiB output block (double-buffered)
_WEIGHT_BLOCK_TARGET = 8 * 1024 * 1024  # weight tile cap
_VMEM_LIMIT = 48 * 1024 * 1024          # headroom under v7x 64 MiB physical
_SPLIT_THRESHOLD = 4 * 1024 * 1024      # split single-block outputs above this


def _pos_enc_kernel(w_ref, o_ref):
    # w_ref: (Rr, C) dense weight tile in VMEM
    # o_ref: (Bb, Rr, C) output tile; broadcast along the leading batch dim
    # is whole-tile replication (no lane/sublane shuffles).
    o_ref[...] = jnp.broadcast_to(w_ref[...], o_ref.shape)


def _pick_lane_width(F: int) -> int | None:
    """Largest 128-multiple divisor of F (capped at 2048 lanes), or None."""
    if F % 128 != 0:
        return None
    c = (min(F, 2048) // 128) * 128
    while c >= 128:
        if F % c == 0:
            return c
        c -= 128
    return 128  # unreachable: 128 always divides F here


def _round_up(x: int, m: int) -> int:
    return ((x + m - 1) // m) * m


def positional_encoding(weight: jax.Array, batch_size: int) -> jax.Array:
    """Broadcast the (L, H) positional embedding table to (B, L, H)."""
    L, H = weight.shape
    B = batch_size
    F = L * H
    itemsize = jnp.dtype(weight.dtype).itemsize

    # ---- wrapper-side layout: dense 2-D (R, C) slab, lane dim a 128-multiple
    C = _pick_lane_width(F)
    if C is None:
        # Fallback: natural (L, H) layout (full dims satisfy the (8,128) rule).
        R, C = L, H
        w2d = weight
    else:
        R = F // C
        w2d = weight.reshape(R, C)

    c_pad = _round_up(C, 128)
    row_bytes = c_pad * itemsize

    # ---- weight (R) tile: full if it fits the weight budget, else 8-aligned
    if R * row_bytes <= _WEIGHT_BLOCK_TARGET:
        Rr = R
    else:
        Rr = min(R, max(8, (_WEIGHT_BLOCK_TARGET // row_bytes) // 8 * 8))
    rr_pad = _round_up(Rr, 8)
    out_row_bytes = rr_pad * row_bytes  # one batch row-slab of the out block

    # ---- batch tile: fill ~8 MiB output blocks (leading dim, no alignment)
    Bb = min(B, max(1, _OUT_BLOCK_TARGET // out_row_bytes))

    n_r = pl.cdiv(R, Rr)
    n_b = pl.cdiv(B, Bb)

    # ---- v7x megacore: ensure >= 2 parallel blocks for non-trivial outputs
    total_out_bytes = B * _round_up(R, 8) * c_pad * itemsize
    if n_r == 1 and n_b == 1 and total_out_bytes > _SPLIT_THRESHOLD:
        if B >= 2:
            Bb = pl.cdiv(B, 2)
            n_b = pl.cdiv(B, Bb)
        elif R > 8:
            Rr = min(R, max(8, _round_up((R + 1) // 2, 8)))
            n_r = pl.cdiv(R, Rr)

    out3d = pl.pallas_call(
        _pos_enc_kernel,
        out_shape=jax.ShapeDtypeStruct((B, R, C), weight.dtype),
        grid_spec=pltpu.PrefetchScalarGridSpec(
            num_scalar_prefetch=0,
            # R tiles outer, batch blocks inner: the weight block index is
            # constant across the inner loop -> DMA'd once per R tile.
            grid=(n_r, n_b),
            in_specs=[pl.BlockSpec((Rr, C), lambda r, b: (r, 0))],
            out_specs=pl.BlockSpec((Bb, Rr, C), lambda r, b: (b, r, 0)),
        ),
        compiler_params=pltpu.CompilerParams(
            dimension_semantics=("parallel", "parallel"),
            vmem_limit_bytes=_VMEM_LIMIT,
        ),
    )(w2d)

    # Pure layout plumbing back to the module's (B, L, H) output.
    return out3d.reshape(B, L, H)


if __name__ == "__main__":
    # Small shapes consistent with the module.
    batch_size = 2
    max_length = 8        # L (seq)
    hidden_size = 32      # H

    key = jax.random.PRNGKey(0)
    k_w, k_x = jax.random.split(key)

    # nn.Embedding default init: N(0, 1). Deterministic synthetic weight.
    embedding_weight = jax.random.normal(
        k_w, (max_length, hidden_size), dtype=jnp.float32
    )

    # Input tensor: only its batch dim matters for the forward pass.
    x = jax.random.normal(k_x, (batch_size, max_length, hidden_size),
                          dtype=jnp.float32)

    out = positional_encoding(embedding_weight, x.shape[0])
    out = jax.block_until_ready(out)

    # Reference check (plain JAX broadcast, same as torch repeat).
    ref = jnp.broadcast_to(embedding_weight[None, :, :],
                           (batch_size, max_length, hidden_size))
    assert out.shape == (batch_size, max_length, hidden_size)
    assert out.dtype == jnp.float32
    assert jnp.array_equal(out, ref)

    print("KERNEL_OK")
</pallas_src>

<mosaic_0001>
module attributes {stable_mosaic.version = 11 : i64} {
  func.func @_pos_enc_kernel(%arg0: i32, %arg1: i32, %arg2: memref<1x256xf32, #tpu.memory_space<vmem>>, %arg3: memref<2x1x256xf32, #tpu.memory_space<vmem>>) attributes {dimension_semantics = [#tpu.dimension_semantics<parallel>, #tpu.dimension_semantics<parallel>], iteration_bounds = array<i64: 1, 1>, scalar_prefetch = 0 : i64, scratch_operands = 0 : i64, tpu.core_type = #tpu.core_type<tc>, window_params = [{transform_indices = @transform_0, window_bounds = array<i64: 1, 256>}, {transform_indices = @transform_1, window_bounds = array<i64: 2, 1, 256>}]} {
    %c0 = arith.constant 0 : index
    %c0_0 = arith.constant 0 : index
    %0 = vector.load %arg2[%c0, %c0_0] : memref<1x256xf32, #tpu.memory_space<vmem>>, vector<1x256xf32>
    %1 = vector.shape_cast %0 : vector<1x256xf32> to vector<1x1x256xf32>
    %2 = vector.broadcast %1 : vector<1x1x256xf32> to vector<2x1x256xf32>
    %c0_1 = arith.constant 0 : index
    %c0_2 = arith.constant 0 : index
    %c0_3 = arith.constant 0 : index
    %3 = vector.load %arg3[%c0_1, %c0_2, %c0_3] : memref<2x1x256xf32, #tpu.memory_space<vmem>>, vector<2x1x256xf32>
    tpu.vector_store %arg3[%c0_1, %c0_2, %c0_3], %2 {strides = array<i32>} : memref<2x1x256xf32, #tpu.memory_space<vmem>>, vector<2x1x256xf32>,
    return
  }
  func.func @transform_0(%arg0: i32, %arg1: i32) -> (i32, i32) {
    %c0_i32 = arith.constant 0 : i32
    %c0_i32_0 = arith.constant 0 : i32
    return %arg0, %c0_i32 : i32, i32
  }
  func.func @transform_1(%arg0: i32, %arg1: i32) -> (i32, i32, i32) {
    %c0_i32 = arith.constant 0 : i32
    %c0_i32_0 = arith.constant 0 : i32
    return %arg1, %arg0, %c0_i32 : i32, i32, i32
  }
}

</mosaic_0001>

<bundles_post_ra>
// kernel: tpu_custom_call.1
= control target key start
LH: loop header
LB: loop body
LE: loop exit
PB: predicated region body
PF: predicated region fallthrough
CT: control target
= control target key end

     0   :  { %6 = vsyncpa [#allocation3], 0  ;;  %s135_s0 = inlined_call_operand.hbm [shape: f32[1,256], index: 0, kind: input, shape index: {}]   ;;  %s136_s1 = inlined_call_operand.hbm [shape: f32[2,1,256], index: 1, kind: output, shape index: {}]  }
   0x1   :  { %7 = vsyncpa [#allocation4], 0  ;;  %s97_s6 = smov [#allocation2]   ;;  %s49_s10 = scalar_lea.hbm %s135_s0, 32 }
   0x2   :  { %s14_s7 = sshll.u32 %s97_s6, 4  ;;  %p50_p0 = scmp.ne.s32.totalorder %s135_s0, %s49_s10  ;;  %s15_s7 = int_to_ptr.vmem [resolvable:$true] %s14_s7 }
   0x3   :  { %p53_p1 = scmp.lt.u32.totalorder %s49_s10, %s135_s0 }
   0x5   :  { %p55_p2 = pnand %p53_p1, %p50_p0 }
   0x7   :  { %58 = shalt.err (!%p55_p2)
}
   0x8   :  { %s59_s15 = scalar_lea.vmem %s15_s7, 32  ;;  %p64_p4 = scmp.lt.s32.totalorder %s15_s7, %s15_s7 }
   0x9   :  { %p60_p3 = scmp.ne.s32.totalorder %s15_s7, %s59_s15  ;;  %p65_p5 = scmp.lt.s32.totalorder %s59_s15, %s59_s15 }
   0xb   :  { %p66_p6 = por %p65_p5, %p64_p4 }
   0xd   :  { %p67_p7 = pnand %p66_p6, %p60_p3 }
   0xf   :  { %70 = shalt.err (!%p67_p7)
}
  0x10   :  { %17 = dma.hbm_to_vmem [thread:$0]  %s135_s0, 32, %s15_s7, [#allocation3]  }
  0x11   :  { %93 = dma.done.wait [#allocation3], 32  }
  0x12   :  { %94 = vsyncadd [#allocation3], 4294967264  ;;  %v22_v0 = vlaneseq  ;;  %s98_s18 = smov [#allocation5]   ;;  %v21_v1 = vld [vmem:[#allocation2] sm:$0x3] }
  0x13   :  { %s33_s19 = sshll.u32 %s98_s18, 4  ;;  %s34_s19 = int_to_ptr.vmem [resolvable:$true] %s33_s19 }
  0x14   :  { %vm24_vm0 = vcmp.lt.s32.totalorder %v22_v0, 256  ;;  %s71_s20 = scalar_lea.vmem %s34_s19, 64  ;;  %p76_p9 = scmp.lt.s32.totalorder %s34_s19, %s34_s19 }
  0x15   :  { %26 = vst.msk [vmem:[#allocation5] sm:$0x3] %vm24_vm0, %v21_v1  ;;  %27 = vst.msk [vmem:[#allocation5 + $0x2] sm:$0x3] %vm24_vm0, %v21_v1  ;;  %p72_p8 = scmp.ne.s32.totalorder %s34_s19, %s71_s20  ;;  %p77_p10 = scmp.lt.s32.totalorder %s71_s20, %s71_s20 }
  0x17   :  { %p78_p11 = por %p77_p10, %p76_p9 }
  0x19   :  { %p79_p12 = pnand %p78_p11, %p72_p8 }
  0x1b   :  { %82 = shalt.err (!%p79_p12)
}
  0x1c   :  { %s83_s0 = scalar_lea.hbm %s136_s1, 64 }
  0x1d   :  { %p84_p13 = scmp.ne.s32.totalorder %s136_s1, %s83_s0  ;;  %p87_p0 = scmp.lt.u32.totalorder %s83_s0, %s136_s1 }
  0x1f   :  { %p89_p1 = pnand %p87_p0, %p84_p13 }
  0x21   :  { %92 = shalt.err (!%p89_p1)
}
  0x22   :  { %s99_s27 = smov 32   ;;  %s100_s28 = smov 2  }
  0x23   :  { %39 = dma.vmem_to_hbm [thread:$0]  %s34_s19, 64, %s136_s1, [#allocation4], %s99_s27, %s99_s27, %s100_s28  }
  0x24   :  { %95 = dma.done.wait [#allocation4], 64  }
  0x25   :  { %96 = vsyncadd [#allocation4], 4294967232 }
  0x26   :  { %43 = vsyncpa [#allocation3], 1 }
  0x27   :  { %44 = vsyncpa [#allocation4], 1 }

</bundles_post_ra>
